<compile_context>
chip_gen: v6e
topology: v6e:2x2x1
jax: 0.10.0
libtpu: 0.0.40
codegen_flags: <defaults>
</compile_context>

<pallas_src>
import functools

import jax
import jax.numpy as jnp
from jax.experimental import pallas as pl
from jax.experimental.pallas import tpu as pltpu


def _res2tsm_kernel(x_ref, w_ref, gamma_ref, beta_ref, o_ref, *,
                    scale, width, fold, T, F, eps):
    """x_ref/o_ref: (C, N) with N = B*T*F (lane axis, b-major / t / f-minor).
       w_ref: (scale-1, 3, width, 1); gamma_ref/beta_ref: (C, 1)."""
    C, N = x_ref.shape
    seg = T * F
    inv_n = 1.0 / N

    # Hoisted lane->time masks (built once, reused by every roll).
    lane = jax.lax.broadcasted_iota(jnp.int32, (width, N), 1)
    pos = lane % seg                       # position inside one (T, F) segment
    t_first = pos < F                      # t == 0
    t_last = pos >= (T - 1) * F            # t == T-1

    def prev_t(v):
        # out[t] = in[t-1], zero at t==0.  Roll wraps across batch segments,
        # but those lanes are exactly the t==0 lanes -> masked to zero.
        return jnp.where(t_first, 0.0, pltpu.roll(v, F, 1))

    def next_t(v):
        # out[t] = in[t+1], zero at t==T-1.
        return jnp.where(t_last, 0.0, pltpu.roll(v, N - F, 1))

    def shifted_group(i):
        """Channels [i*width, (i+1)*width) after the TemporalShift."""
        lo, hi = i * width, (i + 1) * width
        g = x_ref[lo:hi, :]                                # (width, N)
        if lo >= 2 * fold:                                 # untouched channels
            return g
        row = jax.lax.broadcasted_iota(jnp.int32, (width, N), 0) + lo
        res = g
        if hi > fold:                                      # rows in [fold, 2*fold)
            res = jnp.where((row >= fold) & (row < 2 * fold), prev_t(g), res)
        if lo < fold:                                      # rows in [0, fold)
            res = jnp.where(row < fold, next_t(g), res)
        return res

    def bn_relu_store(g, lo):
        """Per-channel (training-mode) BN + ReLU, stored into o_ref[lo:lo+width]."""
        hi = lo + width
        s = jnp.sum(g, axis=1, keepdims=True)              # (width, 1)
        sq = jnp.sum(g * g, axis=1, keepdims=True)         # (width, 1)
        mean = s * inv_n
        var = sq * inv_n - mean * mean                     # biased (BN fwd)
        inv_std = jax.lax.rsqrt(var + eps)
        res = (g - mean) * inv_std * gamma_ref[lo:hi, :] + beta_ref[lo:hi, :]
        o_ref[lo:hi, :] = jnp.maximum(res, 0.0).astype(o_ref.dtype)

    # ---- Res2Net hierarchy with fused per-group BN + ReLU + store ----
    y = shifted_group(0)
    bn_relu_store(y, 0)
    for i in range(1, scale):
        sp = shifted_group(i) + y
        # depthwise (3,1) cross-correlation along T, padding 1:
        #   out[t] = w0*in[t-1] + w1*in[t] + w2*in[t+1]
        conv = (w_ref[i - 1, 0] * prev_t(sp)
                + w_ref[i - 1, 1] * sp
                + w_ref[i - 1, 2] * next_t(sp))
        y = conv
        bn_relu_store(conv, i * width)


def res2tsm_forward(x, conv_w, gamma, beta, *, scale=4, shift_div=8, eps=1e-5):
    """x: (B, C, T, F) f32; conv_w: (scale-1, width, 3); gamma/beta: (C,)."""
    B, C, T, F = x.shape
    assert C % scale == 0
    width = C // scale
    fold = C // shift_div
    N = B * T * F                                    # 2*8*16 = 256 (2 lane tiles)

    # Lane-dense relayout: (C, B*T*F).  Params passed un-broadcast.
    x2 = jnp.transpose(x, (1, 0, 2, 3)).reshape(C, N).astype(jnp.float32)
    w_t = jnp.transpose(conv_w, (0, 2, 1))[..., None].astype(jnp.float32)  # (s-1,3,w,1)
    g2 = gamma.reshape(C, 1).astype(jnp.float32)
    b2 = beta.reshape(C, 1).astype(jnp.float32)

    kernel = functools.partial(_res2tsm_kernel, scale=scale, width=width,
                               fold=fold, T=T, F=F, eps=eps)
    out2 = pl.pallas_call(
        kernel,
        out_shape=jax.ShapeDtypeStruct((C, N), x.dtype),
        in_specs=[pl.BlockSpec(memory_space=pltpu.MemorySpace.VMEM)] * 4,
        out_specs=pl.BlockSpec(memory_space=pltpu.MemorySpace.VMEM),
    )(x2, w_t, g2, b2)

    return jnp.transpose(out2.reshape(C, B, T, F), (1, 0, 2, 3))


def ref_forward(x, conv_w, gamma, beta, *, scale=4, shift_div=8, eps=1e-5):
    """Pure-JAX reference mirroring the PyTorch module (training-mode BN)."""
    B, C, T, F = x.shape
    width = C // scale
    fold = C // shift_div
    t = jnp.transpose(x, (0, 2, 1, 3))               # (B, T, C, F)
    out = jnp.zeros_like(t)
    out = out.at[:, :-1, :fold, :].set(t[:, 1:, :fold, :])
    out = out.at[:, 1:, fold:2 * fold, :].set(t[:, :-1, fold:2 * fold, :])
    out = out.at[:, :, 2 * fold:, :].set(t[:, :, 2 * fold:, :])
    xs = jnp.transpose(out, (0, 2, 1, 3))            # (B, C, T, F)

    splits = [xs[:, i * width:(i + 1) * width] for i in range(scale)]
    y = splits[0]
    outs = [y]
    for i in range(1, scale):
        sp = splits[i] + y
        wk = conv_w[i - 1][:, None, :, None]         # (width, 1, 3, 1)  OIHW
        sp = jax.lax.conv_general_dilated(
            sp, wk, window_strides=(1, 1), padding=((1, 1), (0, 0)),
            dimension_numbers=('NCHW', 'OIHW', 'NCHW'),
            feature_group_count=width)
        y = sp
        outs.append(sp)
    o = jnp.concatenate(outs, axis=1)
    mean = jnp.mean(o, axis=(0, 2, 3), keepdims=True)
    var = jnp.var(o, axis=(0, 2, 3), keepdims=True)  # biased, as BN uses in fwd
    o = (o - mean) / jnp.sqrt(var + eps)
    o = o * gamma[None, :, None, None] + beta[None, :, None, None]
    return jnp.maximum(o, 0.0)


if __name__ == "__main__":
    # Small shapes consistent with the module: B=2, C=16, T=8, F=16,
    # scale=4 -> width=4, shift_div=8 -> fold=2.  B*T*F = 256 (lane-dense).
    B, C, T, F = 2, 16, 8, 16
    scale, shift_div = 4, 8
    width = C // scale

    key = jax.random.PRNGKey(0)
    kx, kw, kg, kb = jax.random.split(key, 4)
    x = jax.random.normal(kx, (B, C, T, F), dtype=jnp.float32)
    # Depthwise Conv2d weights: PyTorch shape (width, 1, 3, 1) -> stored as (scale-1, width, 3)
    conv_w = 0.3 * jax.random.normal(kw, (scale - 1, width, 3), dtype=jnp.float32)
    gamma = 1.0 + 0.1 * jax.random.normal(kg, (C,), dtype=jnp.float32)
    beta = 0.1 * jax.random.normal(kb, (C,), dtype=jnp.float32)

    out = res2tsm_forward(x, conv_w, gamma, beta, scale=scale, shift_div=shift_div)
    out = jax.block_until_ready(out)

    ref = jax.block_until_ready(
        ref_forward(x, conv_w, gamma, beta, scale=scale, shift_div=shift_div))

    assert out.shape == (B, C, T, F)
    assert jnp.allclose(out, ref, atol=1e-4, rtol=1e-4), \
        f"max err {jnp.max(jnp.abs(out - ref))}"
    print("KERNEL_OK")
</pallas_src>

<mosaic_0001>
module attributes {stable_mosaic.version = 11 : i64} {
  func.func @_res2tsm_kernel(%arg0: memref<16x256xf32, #tpu.memory_space<vmem>>, %arg1: memref<3x3x4x1xf32, #tpu.memory_space<vmem>>, %arg2: memref<16x1xf32, #tpu.memory_space<vmem>>, %arg3: memref<16x1xf32, #tpu.memory_space<vmem>>, %arg4: memref<16x256xf32, #tpu.memory_space<vmem>>) attributes {dimension_semantics = [], scalar_prefetch = 0 : i64, scratch_operands = 0 : i64, tpu.core_type = #tpu.core_type<tc>} {
    %0 = tpu.iota {dimensions = array<i32: 1>} : vector<4x256xi32>
    %c128_i32 = arith.constant 128 : i32
    %c0_i32 = arith.constant 0 : i32
    %1 = arith.cmpi eq, %c128_i32, %c0_i32 : i32
    %c1_i32 = arith.constant 1 : i32
    %2 = arith.select %1, %c1_i32, %c128_i32 : i32
    %3 = vector.broadcast %2 : i32 to vector<4x256xi32>
    %4 = arith.remsi %0, %3 : vector<4x256xi32>
    %c0_i32_0 = arith.constant 0 : i32
    %5 = vector.broadcast %c0_i32_0 : i32 to vector<4x256xi32>
    %6 = arith.cmpi ne, %4, %5 : vector<4x256xi32>
    %c0_i32_1 = arith.constant 0 : i32
    %7 = vector.broadcast %c0_i32_1 : i32 to vector<4x256xi32>
    %8 = arith.cmpi slt, %4, %7 : vector<4x256xi32>
    %c0_i32_2 = arith.constant 0 : i32
    %9 = arith.cmpi slt, %2, %c0_i32_2 : i32
    %10 = vector.broadcast %9 : i1 to vector<4x256xi1>
    %11 = vector.broadcast %10 : vector<4x256xi1> to vector<4x256xi1>
    %12 = arith.xori %8, %11 : vector<4x256xi1>
    %13 = arith.andi %12, %6 : vector<4x256xi1>
    %14 = vector.broadcast %2 : i32 to vector<4x256xi32>
    %15 = arith.addi %4, %14 : vector<4x256xi32>
    %16 = arith.select %13, %15, %4 : vector<4x256xi1>, vector<4x256xi32>
    %c16_i32 = arith.constant 16 : i32
    %17 = vector.broadcast %c16_i32 : i32 to vector<4x256xi32>
    %18 = arith.cmpi slt, %16, %17 : vector<4x256xi32>
    %c112_i32 = arith.constant 112 : i32
    %19 = vector.broadcast %c112_i32 : i32 to vector<4x256xi32>
    %20 = arith.cmpi sge, %16, %19 : vector<4x256xi32>
    %c0 = arith.constant 0 : index
    %c0_3 = arith.constant 0 : index
    %21 = vector.load %arg0[%c0, %c0_3] : memref<16x256xf32, #tpu.memory_space<vmem>>, vector<4x256xf32>
    %22 = tpu.iota {dimensions = array<i32: 0>} : vector<4x256xi32>
    %c0_i32_4 = arith.constant 0 : i32
    %23 = vector.broadcast %c0_i32_4 : i32 to vector<4x256xi32>
    %24 = arith.addi %22, %23 : vector<4x256xi32>
    %c2_i32 = arith.constant 2 : i32
    %25 = vector.broadcast %c2_i32 : i32 to vector<4x256xi32>
    %26 = arith.cmpi sge, %24, %25 : vector<4x256xi32>
    %c4_i32 = arith.constant 4 : i32
    %27 = vector.broadcast %c4_i32 : i32 to vector<4x256xi32>
    %28 = arith.cmpi slt, %24, %27 : vector<4x256xi32>
    %29 = arith.andi %26, %28 : vector<4x256xi1>
    %c16_i32_5 = arith.constant 16 : i32
    %30 = tpu.dynamic_rotate %21 by %c16_i32_5 dim 1 : vector<4x256xf32>, i32 -> vector<4x256xf32>
    %cst = arith.constant 0.000000e+00 : f32
    %31 = vector.broadcast %cst : f32 to vector<4x256xf32>
    %32 = arith.select %18, %31, %30 : vector<4x256xi1>, vector<4x256xf32>
    %33 = arith.select %29, %32, %21 : vector<4x256xi1>, vector<4x256xf32>
    %c2_i32_6 = arith.constant 2 : i32
    %34 = vector.broadcast %c2_i32_6 : i32 to vector<4x256xi32>
    %35 = arith.cmpi slt, %24, %34 : vector<4x256xi32>
    %c240_i32 = arith.constant 240 : i32
    %36 = tpu.dynamic_rotate %21 by %c240_i32 dim 1 : vector<4x256xf32>, i32 -> vector<4x256xf32>
    %cst_7 = arith.constant 0.000000e+00 : f32
    %37 = vector.broadcast %cst_7 : f32 to vector<4x256xf32>
    %38 = arith.select %20, %37, %36 : vector<4x256xi1>, vector<4x256xf32>
    %39 = arith.select %35, %38, %33 : vector<4x256xi1>, vector<4x256xf32>
    %cst_8 = arith.constant dense<0.000000e+00> : vector<4xf32>
    %40 = vector.multi_reduction <add>, %39, %cst_8 [1] : vector<4x256xf32> to vector<4xf32>
    %41 = vector.shape_cast %40 : vector<4xf32> to vector<4x1xf32>
    %42 = arith.mulf %39, %39 : vector<4x256xf32>
    %cst_9 = arith.constant dense<0.000000e+00> : vector<4xf32>
    %43 = vector.multi_reduction <add>, %42, %cst_9 [1] : vector<4x256xf32> to vector<4xf32>
    %44 = vector.shape_cast %43 : vector<4xf32> to vector<4x1xf32>
    %cst_10 = arith.constant 3.906250e-03 : f32
    %45 = vector.broadcast %cst_10 : f32 to vector<4x1xf32>
    %46 = arith.mulf %41, %45 : vector<4x1xf32>
    %cst_11 = arith.constant 3.906250e-03 : f32
    %47 = vector.broadcast %cst_11 : f32 to vector<4x1xf32>
    %48 = arith.mulf %44, %47 : vector<4x1xf32>
    %49 = arith.mulf %46, %46 : vector<4x1xf32>
    %50 = arith.subf %48, %49 : vector<4x1xf32>
    %cst_12 = arith.constant 9.99999974E-6 : f32
    %51 = vector.broadcast %cst_12 : f32 to vector<4x1xf32>
    %52 = arith.addf %50, %51 : vector<4x1xf32>
    %53 = math.rsqrt %52 : vector<4x1xf32>
    %54 = vector.broadcast %46 : vector<4x1xf32> to vector<4x256xf32>
    %55 = arith.subf %39, %54 : vector<4x256xf32>
    %56 = vector.broadcast %53 : vector<4x1xf32> to vector<4x256xf32>
    %57 = arith.mulf %55, %56 : vector<4x256xf32>
    %c0_13 = arith.constant 0 : index
    %c0_14 = arith.constant 0 : index
    %58 = vector.load %arg2[%c0_13, %c0_14] : memref<16x1xf32, #tpu.memory_space<vmem>>, vector<4x1xf32>
    %59 = vector.broadcast %58 : vector<4x1xf32> to vector<4x256xf32>
    %60 = arith.mulf %57, %59 : vector<4x256xf32>
    %c0_15 = arith.constant 0 : index
    %c0_16 = arith.constant 0 : index
    %61 = vector.load %arg3[%c0_15, %c0_16] : memref<16x1xf32, #tpu.memory_space<vmem>>, vector<4x1xf32>
    %62 = vector.broadcast %61 : vector<4x1xf32> to vector<4x256xf32>
    %63 = arith.addf %60, %62 : vector<4x256xf32>
    %cst_17 = arith.constant 0.000000e+00 : f32
    %64 = vector.broadcast %cst_17 : f32 to vector<4x256xf32>
    %65 = arith.maximumf %63, %64 : vector<4x256xf32>
    %c0_18 = arith.constant 0 : index
    %c0_19 = arith.constant 0 : index
    %66 = vector.load %arg4[%c0_18, %c0_19] : memref<16x256xf32, #tpu.memory_space<vmem>>, vector<4x256xf32>
    tpu.vector_store %arg4[%c0_18, %c0_19], %65 {strides = array<i32>} : memref<16x256xf32, #tpu.memory_space<vmem>>, vector<4x256xf32>,
    %c4 = arith.constant 4 : index
    %c0_20 = arith.constant 0 : index
    %67 = vector.load %arg0[%c4, %c0_20] : memref<16x256xf32, #tpu.memory_space<vmem>>, vector<4x256xf32>
    %68 = arith.addf %67, %39 : vector<4x256xf32>
    %c0_21 = arith.constant 0 : index
    %c0_22 = arith.constant 0 : index
    %c0_23 = arith.constant 0 : index
    %c0_24 = arith.constant 0 : index
    %69 = vector.load %arg1[%c0_21, %c0_22, %c0_23, %c0_24] : memref<3x3x4x1xf32, #tpu.memory_space<vmem>>, vector<1x1x4x1xf32>
    %70 = vector.shape_cast %69 : vector<1x1x4x1xf32> to vector<4x1xf32>
    %c16_i32_25 = arith.constant 16 : i32
    %71 = tpu.dynamic_rotate %68 by %c16_i32_25 dim 1 : vector<4x256xf32>, i32 -> vector<4x256xf32>
    %cst_26 = arith.constant 0.000000e+00 : f32
    %72 = vector.broadcast %cst_26 : f32 to vector<4x256xf32>
    %73 = arith.select %18, %72, %71 : vector<4x256xi1>, vector<4x256xf32>
    %74 = vector.broadcast %70 : vector<4x1xf32> to vector<4x256xf32>
    %75 = arith.mulf %74, %73 : vector<4x256xf32>
    %c0_27 = arith.constant 0 : index
    %c1 = arith.constant 1 : index
    %c0_28 = arith.constant 0 : index
    %c0_29 = arith.constant 0 : index
    %76 = vector.load %arg1[%c0_27, %c1, %c0_28, %c0_29] : memref<3x3x4x1xf32, #tpu.memory_space<vmem>>, vector<1x1x4x1xf32>
    %77 = vector.shape_cast %76 : vector<1x1x4x1xf32> to vector<4x1xf32>
    %78 = vector.broadcast %77 : vector<4x1xf32> to vector<4x256xf32>
    %79 = arith.mulf %78, %68 : vector<4x256xf32>
    %80 = arith.addf %75, %79 : vector<4x256xf32>
    %c0_30 = arith.constant 0 : index
    %c2 = arith.constant 2 : index
    %c0_31 = arith.constant 0 : index
    %c0_32 = arith.constant 0 : index
    %81 = vector.load %arg1[%c0_30, %c2, %c0_31, %c0_32] : memref<3x3x4x1xf32, #tpu.memory_space<vmem>>, vector<1x1x4x1xf32>
    %82 = vector.shape_cast %81 : vector<1x1x4x1xf32> to vector<4x1xf32>
    %c240_i32_33 = arith.constant 240 : i32
    %83 = tpu.dynamic_rotate %68 by %c240_i32_33 dim 1 : vector<4x256xf32>, i32 -> vector<4x256xf32>
    %cst_34 = arith.constant 0.000000e+00 : f32
    %84 = vector.broadcast %cst_34 : f32 to vector<4x256xf32>
    %85 = arith.select %20, %84, %83 : vector<4x256xi1>, vector<4x256xf32>
    %86 = vector.broadcast %82 : vector<4x1xf32> to vector<4x256xf32>
    %87 = arith.mulf %86, %85 : vector<4x256xf32>
    %88 = arith.addf %80, %87 : vector<4x256xf32>
    %cst_35 = arith.constant dense<0.000000e+00> : vector<4xf32>
    %89 = vector.multi_reduction <add>, %88, %cst_35 [1] : vector<4x256xf32> to vector<4xf32>
    %90 = vector.shape_cast %89 : vector<4xf32> to vector<4x1xf32>
    %91 = arith.mulf %88, %88 : vector<4x256xf32>
    %cst_36 = arith.constant dense<0.000000e+00> : vector<4xf32>
    %92 = vector.multi_reduction <add>, %91, %cst_36 [1] : vector<4x256xf32> to vector<4xf32>
    %93 = vector.shape_cast %92 : vector<4xf32> to vector<4x1xf32>
    %cst_37 = arith.constant 3.906250e-03 : f32
    %94 = vector.broadcast %cst_37 : f32 to vector<4x1xf32>
    %95 = arith.mulf %90, %94 : vector<4x1xf32>
    %cst_38 = arith.constant 3.906250e-03 : f32
    %96 = vector.broadcast %cst_38 : f32 to vector<4x1xf32>
    %97 = arith.mulf %93, %96 : vector<4x1xf32>
    %98 = arith.mulf %95, %95 : vector<4x1xf32>
    %99 = arith.subf %97, %98 : vector<4x1xf32>
    %cst_39 = arith.constant 9.99999974E-6 : f32
    %100 = vector.broadcast %cst_39 : f32 to vector<4x1xf32>
    %101 = arith.addf %99, %100 : vector<4x1xf32>
    %102 = math.rsqrt %101 : vector<4x1xf32>
    %103 = vector.broadcast %95 : vector<4x1xf32> to vector<4x256xf32>
    %104 = arith.subf %88, %103 : vector<4x256xf32>
    %105 = vector.broadcast %102 : vector<4x1xf32> to vector<4x256xf32>
    %106 = arith.mulf %104, %105 : vector<4x256xf32>
    %c4_40 = arith.constant 4 : index
    %c0_41 = arith.constant 0 : index
    %107 = vector.load %arg2[%c4_40, %c0_41] : memref<16x1xf32, #tpu.memory_space<vmem>>, vector<4x1xf32>
    %108 = vector.broadcast %107 : vector<4x1xf32> to vector<4x256xf32>
    %109 = arith.mulf %106, %108 : vector<4x256xf32>
    %c4_42 = arith.constant 4 : index
    %c0_43 = arith.constant 0 : index
    %110 = vector.load %arg3[%c4_42, %c0_43] : memref<16x1xf32, #tpu.memory_space<vmem>>, vector<4x1xf32>
    %111 = vector.broadcast %110 : vector<4x1xf32> to vector<4x256xf32>
    %112 = arith.addf %109, %111 : vector<4x256xf32>
    %cst_44 = arith.constant 0.000000e+00 : f32
    %113 = vector.broadcast %cst_44 : f32 to vector<4x256xf32>
    %114 = arith.maximumf %112, %113 : vector<4x256xf32>
    %c4_45 = arith.constant 4 : index
    %c0_46 = arith.constant 0 : index
    %115 = vector.load %arg4[%c4_45, %c0_46] : memref<16x256xf32, #tpu.memory_space<vmem>>, vector<4x256xf32>
    tpu.vector_store %arg4[%c4_45, %c0_46], %114 {strides = array<i32>} : memref<16x256xf32, #tpu.memory_space<vmem>>, vector<4x256xf32>,
    %c8 = arith.constant 8 : index
    %c0_47 = arith.constant 0 : index
    %116 = vector.load %arg0[%c8, %c0_47] : memref<16x256xf32, #tpu.memory_space<vmem>>, vector<4x256xf32>
    %117 = arith.addf %116, %88 : vector<4x256xf32>
    %c1_48 = arith.constant 1 : index
    %c0_49 = arith.constant 0 : index
    %c0_50 = arith.constant 0 : index
    %c0_51 = arith.constant 0 : index
    %118 = vector.load %arg1[%c1_48, %c0_49, %c0_50, %c0_51] : memref<3x3x4x1xf32, #tpu.memory_space<vmem>>, vector<1x1x4x1xf32>
    %119 = vector.shape_cast %118 : vector<1x1x4x1xf32> to vector<4x1xf32>
    %c16_i32_52 = arith.constant 16 : i32
    %120 = tpu.dynamic_rotate %117 by %c16_i32_52 dim 1 : vector<4x256xf32>, i32 -> vector<4x256xf32>
    %cst_53 = arith.constant 0.000000e+00 : f32
    %121 = vector.broadcast %cst_53 : f32 to vector<4x256xf32>
    %122 = arith.select %18, %121, %120 : vector<4x256xi1>, vector<4x256xf32>
    %123 = vector.broadcast %119 : vector<4x1xf32> to vector<4x256xf32>
    %124 = arith.mulf %123, %122 : vector<4x256xf32>
    %c1_54 = arith.constant 1 : index
    %c1_55 = arith.constant 1 : index
    %c0_56 = arith.constant 0 : index
    %c0_57 = arith.constant 0 : index
    %125 = vector.load %arg1[%c1_54, %c1_55, %c0_56, %c0_57] : memref<3x3x4x1xf32, #tpu.memory_space<vmem>>, vector<1x1x4x1xf32>
    %126 = vector.shape_cast %125 : vector<1x1x4x1xf32> to vector<4x1xf32>
    %127 = vector.broadcast %126 : vector<4x1xf32> to vector<4x256xf32>
    %128 = arith.mulf %127, %117 : vector<4x256xf32>
    %129 = arith.addf %124, %128 : vector<4x256xf32>
    %c1_58 = arith.constant 1 : index
    %c2_59 = arith.constant 2 : index
    %c0_60 = arith.constant 0 : index
    %c0_61 = arith.constant 0 : index
    %130 = vector.load %arg1[%c1_58, %c2_59, %c0_60, %c0_61] : memref<3x3x4x1xf32, #tpu.memory_space<vmem>>, vector<1x1x4x1xf32>
    %131 = vector.shape_cast %130 : vector<1x1x4x1xf32> to vector<4x1xf32>
    %c240_i32_62 = arith.constant 240 : i32
    %132 = tpu.dynamic_rotate %117 by %c240_i32_62 dim 1 : vector<4x256xf32>, i32 -> vector<4x256xf32>
    %cst_63 = arith.constant 0.000000e+00 : f32
    %133 = vector.broadcast %cst_63 : f32 to vector<4x256xf32>
    %134 = arith.select %20, %133, %132 : vector<4x256xi1>, vector<4x256xf32>
    %135 = vector.broadcast %131 : vector<4x1xf32> to vector<4x256xf32>
    %136 = arith.mulf %135, %134 : vector<4x256xf32>
    %137 = arith.addf %129, %136 : vector<4x256xf32>
    %cst_64 = arith.constant dense<0.000000e+00> : vector<4xf32>
    %138 = vector.multi_reduction <add>, %137, %cst_64 [1] : vector<4x256xf32> to vector<4xf32>
    %139 = vector.shape_cast %138 : vector<4xf32> to vector<4x1xf32>
    %140 = arith.mulf %137, %137 : vector<4x256xf32>
    %cst_65 = arith.constant dense<0.000000e+00> : vector<4xf32>
    %141 = vector.multi_reduction <add>, %140, %cst_65 [1] : vector<4x256xf32> to vector<4xf32>
    %142 = vector.shape_cast %141 : vector<4xf32> to vector<4x1xf32>
    %cst_66 = arith.constant 3.906250e-03 : f32
    %143 = vector.broadcast %cst_66 : f32 to vector<4x1xf32>
    %144 = arith.mulf %139, %143 : vector<4x1xf32>
    %cst_67 = arith.constant 3.906250e-03 : f32
    %145 = vector.broadcast %cst_67 : f32 to vector<4x1xf32>
    %146 = arith.mulf %142, %145 : vector<4x1xf32>
    %147 = arith.mulf %144, %144 : vector<4x1xf32>
    %148 = arith.subf %146, %147 : vector<4x1xf32>
    %cst_68 = arith.constant 9.99999974E-6 : f32
    %149 = vector.broadcast %cst_68 : f32 to vector<4x1xf32>
    %150 = arith.addf %148, %149 : vector<4x1xf32>
    %151 = math.rsqrt %150 : vector<4x1xf32>
    %152 = vector.broadcast %144 : vector<4x1xf32> to vector<4x256xf32>
    %153 = arith.subf %137, %152 : vector<4x256xf32>
    %154 = vector.broadcast %151 : vector<4x1xf32> to vector<4x256xf32>
    %155 = arith.mulf %153, %154 : vector<4x256xf32>
    %c8_69 = arith.constant 8 : index
    %c0_70 = arith.constant 0 : index
    %156 = vector.load %arg2[%c8_69, %c0_70] : memref<16x1xf32, #tpu.memory_space<vmem>>, vector<4x1xf32>
    %157 = vector.broadcast %156 : vector<4x1xf32> to vector<4x256xf32>
    %158 = arith.mulf %155, %157 : vector<4x256xf32>
    %c8_71 = arith.constant 8 : index
    %c0_72 = arith.constant 0 : index
    %159 = vector.load %arg3[%c8_71, %c0_72] : memref<16x1xf32, #tpu.memory_space<vmem>>, vector<4x1xf32>
    %160 = vector.broadcast %159 : vector<4x1xf32> to vector<4x256xf32>
    %161 = arith.addf %158, %160 : vector<4x256xf32>
    %cst_73 = arith.constant 0.000000e+00 : f32
    %162 = vector.broadcast %cst_73 : f32 to vector<4x256xf32>
    %163 = arith.maximumf %161, %162 : vector<4x256xf32>
    %c8_74 = arith.constant 8 : index
    %c0_75 = arith.constant 0 : index
    %164 = vector.load %arg4[%c8_74, %c0_75] : memref<16x256xf32, #tpu.memory_space<vmem>>, vector<4x256xf32>
    tpu.vector_store %arg4[%c8_74, %c0_75], %163 {strides = array<i32>} : memref<16x256xf32, #tpu.memory_space<vmem>>, vector<4x256xf32>,
    %c12 = arith.constant 12 : index
    %c0_76 = arith.constant 0 : index
    %165 = vector.load %arg0[%c12, %c0_76] : memref<16x256xf32, #tpu.memory_space<vmem>>, vector<4x256xf32>
    %166 = arith.addf %165, %137 : vector<4x256xf32>
    %c2_77 = arith.constant 2 : index
    %c0_78 = arith.constant 0 : index
    %c0_79 = arith.constant 0 : index
    %c0_80 = arith.constant 0 : index
    %167 = vector.load %arg1[%c2_77, %c0_78, %c0_79, %c0_80] : memref<3x3x4x1xf32, #tpu.memory_space<vmem>>, vector<1x1x4x1xf32>
    %168 = vector.shape_cast %167 : vector<1x1x4x1xf32> to vector<4x1xf32>
    %c16_i32_81 = arith.constant 16 : i32
    %169 = tpu.dynamic_rotate %166 by %c16_i32_81 dim 1 : vector<4x256xf32>, i32 -> vector<4x256xf32>
    %cst_82 = arith.constant 0.000000e+00 : f32
    %170 = vector.broadcast %cst_82 : f32 to vector<4x256xf32>
    %171 = arith.select %18, %170, %169 : vector<4x256xi1>, vector<4x256xf32>
    %172 = vector.broadcast %168 : vector<4x1xf32> to vector<4x256xf32>
    %173 = arith.mulf %172, %171 : vector<4x256xf32>
    %c2_83 = arith.constant 2 : index
    %c1_84 = arith.constant 1 : index
    %c0_85 = arith.constant 0 : index
    %c0_86 = arith.constant 0 : index
    %174 = vector.load %arg1[%c2_83, %c1_84, %c0_85, %c0_86] : memref<3x3x4x1xf32, #tpu.memory_space<vmem>>, vector<1x1x4x1xf32>
    %175 = vector.shape_cast %174 : vector<1x1x4x1xf32> to vector<4x1xf32>
    %176 = vector.broadcast %175 : vector<4x1xf32> to vector<4x256xf32>
    %177 = arith.mulf %176, %166 : vector<4x256xf32>
    %178 = arith.addf %173, %177 : vector<4x256xf32>
    %c2_87 = arith.constant 2 : index
    %c2_88 = arith.constant 2 : index
    %c0_89 = arith.constant 0 : index
    %c0_90 = arith.constant 0 : index
    %179 = vector.load %arg1[%c2_87, %c2_88, %c0_89, %c0_90] : memref<3x3x4x1xf32, #tpu.memory_space<vmem>>, vector<1x1x4x1xf32>
    %180 = vector.shape_cast %179 : vector<1x1x4x1xf32> to vector<4x1xf32>
    %c240_i32_91 = arith.constant 240 : i32
    %181 = tpu.dynamic_rotate %166 by %c240_i32_91 dim 1 : vector<4x256xf32>, i32 -> vector<4x256xf32>
    %cst_92 = arith.constant 0.000000e+00 : f32
    %182 = vector.broadcast %cst_92 : f32 to vector<4x256xf32>
    %183 = arith.select %20, %182, %181 : vector<4x256xi1>, vector<4x256xf32>
    %184 = vector.broadcast %180 : vector<4x1xf32> to vector<4x256xf32>
    %185 = arith.mulf %184, %183 : vector<4x256xf32>
    %186 = arith.addf %178, %185 : vector<4x256xf32>
    %cst_93 = arith.constant dense<0.000000e+00> : vector<4xf32>
    %187 = vector.multi_reduction <add>, %186, %cst_93 [1] : vector<4x256xf32> to vector<4xf32>
    %188 = vector.shape_cast %187 : vector<4xf32> to vector<4x1xf32>
    %189 = arith.mulf %186, %186 : vector<4x256xf32>
    %cst_94 = arith.constant dense<0.000000e+00> : vector<4xf32>
    %190 = vector.multi_reduction <add>, %189, %cst_94 [1] : vector<4x256xf32> to vector<4xf32>
    %191 = vector.shape_cast %190 : vector<4xf32> to vector<4x1xf32>
    %cst_95 = arith.constant 3.906250e-03 : f32
    %192 = vector.broadcast %cst_95 : f32 to vector<4x1xf32>
    %193 = arith.mulf %188, %192 : vector<4x1xf32>
    %cst_96 = arith.constant 3.906250e-03 : f32
    %194 = vector.broadcast %cst_96 : f32 to vector<4x1xf32>
    %195 = arith.mulf %191, %194 : vector<4x1xf32>
    %196 = arith.mulf %193, %193 : vector<4x1xf32>
    %197 = arith.subf %195, %196 : vector<4x1xf32>
    %cst_97 = arith.constant 9.99999974E-6 : f32
    %198 = vector.broadcast %cst_97 : f32 to vector<4x1xf32>
    %199 = arith.addf %197, %198 : vector<4x1xf32>
    %200 = math.rsqrt %199 : vector<4x1xf32>
    %201 = vector.broadcast %193 : vector<4x1xf32> to vector<4x256xf32>
    %202 = arith.subf %186, %201 : vector<4x256xf32>
    %203 = vector.broadcast %200 : vector<4x1xf32> to vector<4x256xf32>
    %204 = arith.mulf %202, %203 : vector<4x256xf32>
    %c12_98 = arith.constant 12 : index
    %c0_99 = arith.constant 0 : index
    %205 = vector.load %arg2[%c12_98, %c0_99] : memref<16x1xf32, #tpu.memory_space<vmem>>, vector<4x1xf32>
    %206 = vector.broadcast %205 : vector<4x1xf32> to vector<4x256xf32>
    %207 = arith.mulf %204, %206 : vector<4x256xf32>
    %c12_100 = arith.constant 12 : index
    %c0_101 = arith.constant 0 : index
    %208 = vector.load %arg3[%c12_100, %c0_101] : memref<16x1xf32, #tpu.memory_space<vmem>>, vector<4x1xf32>
    %209 = vector.broadcast %208 : vector<4x1xf32> to vector<4x256xf32>
    %210 = arith.addf %207, %209 : vector<4x256xf32>
    %cst_102 = arith.constant 0.000000e+00 : f32
    %211 = vector.broadcast %cst_102 : f32 to vector<4x256xf32>
    %212 = arith.maximumf %210, %211 : vector<4x256xf32>
    %c12_103 = arith.constant 12 : index
    %c0_104 = arith.constant 0 : index
    %213 = vector.load %arg4[%c12_103, %c0_104] : memref<16x256xf32, #tpu.memory_space<vmem>>, vector<4x256xf32>
    tpu.vector_store %arg4[%c12_103, %c0_104], %212 {strides = array<i32>} : memref<16x256xf32, #tpu.memory_space<vmem>>, vector<4x256xf32>,
    return
  }
}

</mosaic_0001>

<bundles_post_ra>
// kernel: tpu_custom_call.1
= control target key start
LH: loop header
LB: loop body
LE: loop exit
PB: predicated region body
PF: predicated region fallthrough
CT: control target
= control target key end

     0   :  { %s497_s17 = smov 112   ;;  %s498_s18 = smov 16   ;;  %v499_v2 = vmov 0   ;;  %s770_s0 = inlined_call_operand.vmem [shape: f32[16,256], index: 0, kind: input, shape index: {}]   ;;  %s771_s1 = inlined_call_operand.vmem [shape: f32[3,3,4,1], index: 1, kind: input, shape index: {}]   ;;  %s772_s2 = inlined_call_operand.vmem [shape: f32[16,1], index: 2, kind: input, shape index: {}]   ;;  %s773_s3 = inlined_call_operand.vmem [shape: f32[16,1], index: 3, kind: input, shape index: {}]   ;;  %s774_s4 = inlined_call_operand.hbm [shape: f32[16,256], index: 4, kind: output, shape index: {}]  }
   0x1   :  { %v49_v0 = vld [vmem:[%s770_s0] sm:$0xf]  ;;  %v50_v1 = vld [vmem:[%s770_s0 + $0x8] sm:$0xf]  ;;  %466 = vset.pattern.permute.xlu1 %v499_v2  ;;  %465 = vset.pattern.permute.xlu0 %v499_v2 }
   0x2   :  { %68 = vrot.lane.b32.xlu1 %v49_v0, %s497_s17  ;;  %56 = vrot.lane.b32.xlu0 %v49_v0, %s498_s18 }
   0x3   :  { %9 = vsyncpa [#allocation3], 0  ;;  %v452_v3 = vld [vmem:[%s771_s1 + $0x4] sm:$0xf]  ;;  %v132_v4 = vld [vmem:[%s771_s1] sm:$0xf]  ;;  %v18_v6 = vlaneseq }
   0x4   :  { %v453_v5 = vld [vmem:[%s771_s1 + $0x8] sm:$0xf]  ;;  %v122_v29 = vld [vmem:[%s770_s0] sm:$0xf0]  ;;  %v123_v30 = vld [vmem:[%s770_s0 + $0x8] sm:$0xf0] }
   0x5   :  { %v546_v7 = vand.u32 127, %v18_v6  ;;  %v52_v9 = vshrl.u32 %v18_v6, 7  ;;  %v454_v37 = vld [vmem:[%s771_s1 + $0xc] sm:$0xf]  ;;  %v455_v38 = vld [vmem:[%s771_s1 + $0x10] sm:$0xf] }
   0x6   :  { %70 = vrot.lane.b32.xlu1 %v50_v1, %s497_s17  ;;  %58 = vrot.lane.b32.xlu0 %v50_v1, %s498_s18  ;;  %v456_v39 = vld [vmem:[%s771_s1 + $0x14] sm:$0xf]  ;;  %v232_v63 = vld [vmem:[%s770_s0 + $0x10] sm:$0xf]  ;;  %vm79_vm9 = vcmask 1043456  }
   0x7   :  { %v20_v8 = vadd.s32 128, %v546_v7  ;;  %vm53_vm0 = vcmp.ge.s32.totalorder %v52_v9, 2  ;;  %vm54_vm1 = vcmp.lt.s32.totalorder %v52_v9, 4  ;;  %vm45_vm2 = vcmp.lt.s32.totalorder %v546_v7, 16 }
   0x8   :  { %vm72_vm3 = vcmp.lt.s32.totalorder %v546_v7, 112  ;;  %vm47_vm4 = vcmp.ge.s32.totalorder %v546_v7, 112  ;;  %vm55_vm7 = vmand %vm53_vm0, %vm54_vm1  ;;  %vm67_vm8 = vcmp.lt.s32.totalorder %v52_v9, 2 }
   0x9   :  { %v32_v10 = vand.u32 127, %v20_v8 }
   0xa   :  { %158 = vperm.xlu1 %466, %v452_v3   ;;  %149 = vperm.xlu0 %465, %v132_v4  }
   0xb   :  { %vm552_vm5 = vcmp.ge.s32.totalorder %v32_v10, 112  ;;  %vm556_vm6 = vcmp.lt.s32.totalorder %v32_v10, 16 }
   0xe   :  { %177 = vperm.xlu1 %466, %v453_v5  }
  0x74   :  { %v69_v11 = vpop.permute.xlu1 %68  ;;  %v57_v12 = vpop.permute.xlu0 %56 }
  0x78   :  { %v71_v15 = vpop.permute.xlu1 %70  ;;  %v59_v16 = vpop.permute.xlu0 %58 }
  0x79   :  { %v73_v17 = vsel %vm72_vm3, %v69_v11, %v71_v15  ;;  %v74_v18 = vsel %vm72_vm3, %v71_v15, %v69_v11  ;;  %v61_v19 = vsel %vm45_vm2, %v57_v12, %v59_v16  ;;  %v62_v20 = vsel %vm45_vm2, %v59_v16, %v57_v12  ;;  %v102_v16 = vld [vmem:[%s772_s2] sm:$0xf] }
  0x7a   :  { %v75_v21 = vsel %vm47_vm4, 0.0, %v73_v17  ;;  %v76_v22 = vsel %vm552_vm5, 0.0, %v74_v18  ;;  %v63_v23 = vsel %vm45_vm2, 0.0, %v62_v20  ;;  %v64_v24 = vsel %vm556_vm6, 0.0, %v61_v19  ;;  %v457_v17 = vld [vmem:[%s771_s1 + $0x18] sm:$0xf] }
  0x7b   :  { %v65_v25 = vsel %vm55_vm7, %v63_v23, %v49_v0  ;;  %v66_v26 = vsel %vm55_vm7, %v64_v24, %v50_v1  ;;  %v233_v0 = vld [vmem:[%s770_s0 + $0x18] sm:$0xf]  ;;  %v459_v18 = vld [vmem:[%s771_s1 + $0x20] sm:$0xf]  ;;  %v458_v19 = vld [vmem:[%s771_s1 + $0x1c] sm:$0xf] }
  0x7c   :  { %v576_v27 = vsel %vm67_vm8, %v75_v21, %v65_v25  ;;  %v578_v28 = vsel %vm67_vm8, %v76_v22, %v66_v26 }
  0x7d   :  { %v126_v31 = vrot.slane %v576_v27, 4  ;;  %v127_v32 = vrot.slane %v578_v28, 4  ;;  %v85_v5 = vmul.f32 %v576_v27, %v576_v27  ;;  %v86_v6 = vmul.f32 %v578_v28, %v578_v28 }
  0x7e   :  { %v80_v11 = vsel %vm79_vm9, %v576_v27, 0.0  ;;  %v81_v12 = vsel %vm79_vm9, %v578_v28, 0.0 }
  0x7f   :  { %v130_v33 = vadd.f32 %v126_v31, %v122_v29  ;;  %v131_v34 = vadd.f32 %v127_v32, %v123_v30  ;;  %v87_v8 = vsel %vm79_vm9, %v85_v5, 0.0  ;;  %v88_v9 = vsel %vm79_vm9, %v86_v6, 0.0 }
  0x80   :  { %v89_v10 = vadd.f32 %v88_v9, %v87_v8  ;;  %v82_v15 = vadd.f32 %v81_v12, %v80_v11  ;;  %v206_v11 = vld [vmem:[%s772_s2 + $0x4] sm:$0xf] }
  0x81   :  { %v135_v35 = vrot.slane %v130_v33, 4  ;;  %v136_v36 = vrot.slane %v131_v34, 4  ;;  %v214_v12 = vld [vmem:[%s773_s3 + $0x4] sm:$0xf] }
  0x83   :  { %139 = vrot.lane.b32.xlu0 %v135_v35, %s498_s18  ;;  %141 = vrot.lane.b32.xlu1 %v136_v36, %s498_s18 }
  0x85   :  { %v159_v40 = vpop.permute.xlu1 %158  ;;  %v150_v41 = vpop.permute.xlu0 %149 }
  0x86   :  { %v161_v53 = vmul.f32 %v159_v40, %v135_v35  ;;  %v162_v54 = vmul.f32 %v159_v40, %v136_v36 }
  0x87   :  { %167 = vrot.lane.b32.xlu0 %v135_v35, %s497_s17  ;;  %169 = vrot.lane.b32.xlu1 %v136_v36, %s497_s17 }
  0x89   :  { %v178_v42 = vpop.permute.xlu1 %177 }
  0x8b   :  { %248 = vperm.xlu0 %465, %v454_v37   ;;  %257 = vperm.xlu1 %466, %v455_v38  }
  0x8f   :  { %276 = vperm.xlu0 %465, %v456_v39  }
  0xf5   :  { %v140_v43 = vpop.permute.xlu0 %139  ;;  %v142_v44 = vpop.permute.xlu1 %141 }
  0xf6   :  { %v143_v45 = vsel %vm45_vm2, %v140_v43, %v142_v44  ;;  %v144_v46 = vsel %vm45_vm2, %v142_v44, %v140_v43 }
  0xf7   :  { %v145_v47 = vsel %vm45_vm2, 0.0, %v144_v46  ;;  %v146_v48 = vsel %vm556_vm6, 0.0, %v143_v45 }
  0xf8   :  { %v152_v49 = vmul.f32 %v150_v41, %v145_v47  ;;  %v153_v50 = vmul.f32 %v150_v41, %v146_v48  ;;  %v326_v47 = vld [vmem:[%s770_s0 + $0x18] sm:$0xf0]  ;;  %v325_v48 = vld [vmem:[%s770_s0 + $0x10] sm:$0xf0] }
  0xf9   :  { %v168_v51 = vpop.permute.xlu0 %167  ;;  %v170_v52 = vpop.permute.xlu1 %169 }
  0xfa   :  { %v171_v55 = vsel %vm72_vm3, %v168_v51, %v170_v52  ;;  %v172_v56 = vsel %vm72_vm3, %v170_v52, %v168_v51  ;;  %v163_v59 = vadd.f32 %v161_v53, %v152_v49  ;;  %v164_v60 = vadd.f32 %v162_v54, %v153_v50 }
  0xfb   :  { %v173_v57 = vsel %vm47_vm4, 0.0, %v171_v55  ;;  %v174_v58 = vsel %vm552_vm5, 0.0, %v172_v56  ;;  %v110_v55 = vld [vmem:[%s773_s3] sm:$0xf] }
  0xfc   :  { %v180_v61 = vmul.f32 %v178_v42, %v173_v57  ;;  %v181_v62 = vmul.f32 %v178_v42, %v174_v58 }
  0xfe   :  { %v623_v1 = vadd.f32 %v180_v61, %v163_v59  ;;  %v625_v2 = vadd.f32 %v181_v62, %v164_v60 }
 0x100   :  { %v234_v3 = vadd.f32 %v232_v63, %v623_v1  ;;  %v235_v4 = vadd.f32 %v233_v0, %v625_v2  ;;  %v184_v56 = vsel %vm79_vm9, %v623_v1, 0.0  ;;  %v185_v57 = vsel %vm79_vm9, %v625_v2, 0.0 }
 0x101   :  { %v186_v58 = vadd.f32 %v185_v57, %v184_v56  ;;  %v189_v59 = vmul.f32 %v623_v1, %v623_v1  ;;  %v190_v60 = vmul.f32 %v625_v2, %v625_v2 }
 0x102   :  { %238 = vrot.lane.b32.xlu1 %v234_v3, %s498_s18  ;;  %240 = vrot.lane.b32.xlu0 %v235_v4, %s498_s18 }
 0x103   :  { %v191_v61 = vsel %vm79_vm9, %v189_v59, 0.0  ;;  %v192_v62 = vsel %vm79_vm9, %v190_v60, 0.0 }
 0x104   :  { %v193_v63 = vadd.f32 %v192_v62, %v191_v61 }
 0x106   :  { %266 = vrot.lane.b32.xlu1 %v234_v3, %s497_s17  ;;  %268 = vrot.lane.b32.xlu0 %v235_v4, %s497_s17  ;;  %v249_v20 = vpop.permute.xlu0 %248  ;;  %v258_v21 = vpop.permute.xlu1 %257 }
 0x107   :  { %v260_v35 = vmul.f32 %v258_v21, %v234_v3  ;;  %v261_v36 = vmul.f32 %v258_v21, %v235_v4 }
 0x10a   :  { %v277_v22 = vpop.permute.xlu0 %276 }
 0x125   :  { %90 = vadd.xlane.f32.xlu0 %v89_v10 }
 0x12a   :  { %83 = vadd.xlane.f32.xlu1 %v82_v15  ;;  %v305_v15 = vld [vmem:[%s772_s2 + $0x8] sm:$0xf] }
 0x13b   :  { %105 = vperm.xlu0 %465, %v102_v16   ;;  %353 = vperm.xlu1 %466, %v457_v17   ;;  %v418_v16 = vld [vmem:[%s773_s3 + $0xc] sm:$0xf]  ;;  %v313_v17 = vld [vmem:[%s773_s3 + $0x8] sm:$0xf] }
 0x13f   :  { %381 = vperm.xlu0 %465, %v459_v18   ;;  %362 = vperm.xlu1 %466, %v458_v19  }
 0x174   :  { %v239_v23 = vpop.permute.xlu1 %238  ;;  %v241_v24 = vpop.permute.xlu0 %240 }
 0x175   :  { %v242_v25 = vsel %vm45_vm2, %v239_v23, %v241_v24  ;;  %v243_v26 = vsel %vm45_vm2, %v241_v24, %v239_v23 }
 0x176   :  { %v244_v29 = vsel %vm45_vm2, 0.0, %v243_v26  ;;  %v245_v30 = vsel %vm556_vm6, 0.0, %v242_v25 }
 0x177   :  { %v251_v31 = vmul.f32 %v249_v20, %v244_v29  ;;  %v252_v32 = vmul.f32 %v249_v20, %v245_v30 }
 0x178   :  { %v267_v33 = vpop.permute.xlu1 %266  ;;  %v269_v34 = vpop.permute.xlu0 %268 }
 0x179   :  { %v270_v37 = vsel %vm72_vm3, %v267_v33, %v269_v34  ;;  %v271_v38 = vsel %vm72_vm3, %v269_v34, %v267_v33  ;;  %v262_v41 = vadd.f32 %v260_v35, %v251_v31  ;;  %v263_v42 = vadd.f32 %v261_v36, %v252_v32 }
 0x17a   :  { %v272_v39 = vsel %vm47_vm4, 0.0, %v270_v37  ;;  %v273_v40 = vsel %vm552_vm5, 0.0, %v271_v38 }
 0x17b   :  { %v279_v43 = vmul.f32 %v277_v22, %v272_v39  ;;  %v280_v44 = vmul.f32 %v277_v22, %v273_v40 }
 0x17d   :  { %v671_v45 = vadd.f32 %v279_v43, %v262_v41  ;;  %v673_v46 = vadd.f32 %v280_v44, %v263_v42 }
 0x17f   :  { %v330_v49 = vrot.slane %v673_v46, 4  ;;  %v329_v50 = vrot.slane %v671_v45, 4  ;;  %v283_v0 = vsel %vm79_vm9, %v671_v45, 0.0  ;;  %v284_v3 = vsel %vm79_vm9, %v673_v46, 0.0 }
 0x180   :  { %v288_v4 = vmul.f32 %v671_v45, %v671_v45  ;;  %v289_v5 = vmul.f32 %v673_v46, %v673_v46  ;;  %v285_v6 = vadd.f32 %v284_v3, %v283_v0 }
 0x181   :  { %v334_v51 = vadd.f32 %v330_v49, %v326_v47  ;;  %v333_v52 = vadd.f32 %v329_v50, %v325_v48 }
 0x182   :  { %v290_v8 = vsel %vm79_vm9, %v288_v4, 0.0  ;;  %v291_v9 = vsel %vm79_vm9, %v289_v5, 0.0 }
 0x183   :  { %v340_v53 = vrot.slane %v334_v51, 4  ;;  %v339_v54 = vrot.slane %v333_v52, 4  ;;  %v292_v10 = vadd.f32 %v291_v9, %v290_v8  ;;  %v410_v9 = vld [vmem:[%s772_s2 + $0xc] sm:$0xf]  ;;  %s500_s2 = smov [#allocation2]  }
 0x184   :  { %s441_s13 = sshll.u32 %s500_s2, 4  ;;  %s442_s13 = int_to_ptr.vmem [resolvable:$true] %s441_s13 }
 0x185   :  { %345 = vrot.lane.b32.xlu0 %v340_v53, %s498_s18  ;;  %343 = vrot.lane.b32.xlu1 %v339_v54, %s498_s18  ;;  %s475_s14 = scalar_lea.vmem %s442_s13, 512  ;;  %p480_p1 = scmp.lt.s32.totalorder %s442_s13, %s442_s13 }
 0x186   :  { %p476_p0 = scmp.ne.s32.totalorder %s442_s13, %s475_s14  ;;  %p481_p2 = scmp.lt.s32.totalorder %s475_s14, %s475_s14 }
 0x188   :  { %p482_p3 = por %p481_p2, %p480_p1 }
 0x189   :  { %373 = vrot.lane.b32.xlu0 %v340_v53, %s497_s17  ;;  %371 = vrot.lane.b32.xlu1 %v339_v54, %s497_s17 }
 0x18a   :  { %p483_p4 = pnand %p482_p3, %p476_p0 }
 0x18d   :  { %113 = vperm.xlu1 %466, %v110_v55  }
 0x1a8   :  { %187 = vadd.xlane.f32.xlu0 %v186_v58 }
 0x1ae   :  { %v91_v20 = vpop.xlane.xlu0 %90 }
 0x1af   :  { %v93_v22 = vmul.f32 0.00390625, %v91_v20 }
 0x1b1   :  { %194 = vadd.xlane.f32.xlu1 %v193_v63 }
 0x1b3   :  { %v84_v18 = vpop.xlane.xlu1 %83 }
 0x1b4   :  { %v92_v19 = vmul.f32 0.00390625, %v84_v18 }
 0x1b5   :  { %286 = vadd.xlane.f32.xlu1 %v285_v6 }
 0x1b6   :  { %v94_v21 = vmul.f32 %v92_v19, %v92_v19  ;;  %v106_v24 = vpop.permute.xlu0 %105  ;;  %v99_v56 = vsub.f32 %v578_v28, %v92_v19 }
 0x1b7   :  { %v354_v25 = vpop.permute.xlu1 %353 }
 0x1b8   :  { %v95_v23 = vsub.f32 %v93_v22, %v94_v21 }
 0x1b9   :  { %293 = vadd.xlane.f32.xlu1 %v292_v10 }
 0x1ba   :  { %v96_v26 = vadd.f32 1e-05, %v95_v23  ;;  %v382_v29 = vpop.permute.xlu0 %381 }
 0x1bb   :  { %v363_v30 = vpop.permute.xlu1 %362 }
 0x1bc   :  { %467 = vrsqrt.f32 %v96_v26  ;;  %v365_v41 = vmul.f32 %v363_v30, %v339_v54  ;;  %v366_v42 = vmul.f32 %v363_v30, %v340_v53  ;;  %v98_v54 = vsub.f32 %v576_v27, %v92_v19 }
 0x1be   :  { %209 = vperm.xlu0 %465, %v206_v11  }
 0x1c2   :  { %217 = vperm.xlu0 %465, %v214_v12  }
 0x1c6   :  { %308 = vperm.xlu0 %465, %v305_v15  }
 0x1c9   :  { %v468_v52 = vpop.eup %467 }
 0x1ca   :  { %421 = vperm.xlu0 %465, %v418_v16   ;;  %v100_v59 = vmul.f32 %v468_v52, %v98_v54  ;;  %v101_v60 = vmul.f32 %v468_v52, %v99_v56 }
 0x1cc   :  { %v108_v28 = vmul.f32 %v106_v24, %v100_v59  ;;  %v109_v63 = vmul.f32 %v106_v24, %v101_v60 }
 0x1ce   :  { %316 = vperm.xlu0 %465, %v313_v17  }
 0x1f7   :  { %v346_v31 = vpop.permute.xlu0 %345  ;;  %v344_v32 = vpop.permute.xlu1 %343 }
 0x1f8   :  { %v347_v33 = vsel %vm45_vm2, %v344_v32, %v346_v31  ;;  %v348_v34 = vsel %vm45_vm2, %v346_v31, %v344_v32 }
 0x1f9   :  { %v349_v35 = vsel %vm45_vm2, 0.0, %v348_v34  ;;  %v350_v36 = vsel %vm556_vm6, 0.0, %v347_v33 }
 0x1fa   :  { %v356_v37 = vmul.f32 %v354_v25, %v349_v35  ;;  %v357_v38 = vmul.f32 %v354_v25, %v350_v36 }
 0x1fb   :  { %v374_v39 = vpop.permute.xlu0 %373  ;;  %v372_v40 = vpop.permute.xlu1 %371 }
 0x1fc   :  { %v375_v43 = vsel %vm72_vm3, %v372_v40, %v374_v39  ;;  %v376_v44 = vsel %vm72_vm3, %v374_v39, %v372_v40  ;;  %v367_v14 = vadd.f32 %v365_v41, %v356_v37  ;;  %v368_v49 = vadd.f32 %v366_v42, %v357_v38 }
 0x1fd   :  { %v377_v47 = vsel %vm47_vm4, 0.0, %v375_v43  ;;  %v378_v48 = vsel %vm552_vm5, 0.0, %v376_v44 }
 0x1fe   :  { %v384_v50 = vmul.f32 %v382_v29, %v377_v47  ;;  %v385_v51 = vmul.f32 %v382_v29, %v378_v48 }
 0x200   :  { %v741_v55 = vadd.f32 %v384_v50, %v367_v14  ;;  %v743_v53 = vadd.f32 %v385_v51, %v368_v49 }
 0x202   :  { %v388_v7 = vsel %vm79_vm9, %v741_v55, 0.0  ;;  %v389_v13 = vsel %vm79_vm9, %v743_v53, 0.0  ;;  %v393_v57 = vmul.f32 %v741_v55, %v741_v55  ;;  %v394_v58 = vmul.f32 %v743_v53, %v743_v53 }
 0x203   :  { %v390_v61 = vadd.f32 %v389_v13, %v388_v7 }
 0x204   :  { %v395_v62 = vsel %vm79_vm9, %v393_v57, 0.0  ;;  %v396_v27 = vsel %vm79_vm9, %v394_v58, 0.0 }
 0x205   :  { %391 = vadd.xlane.f32.xlu1 %v390_v61  ;;  %v397_v0 = vadd.f32 %v396_v27, %v395_v62 }
 0x208   :  { %v114_v3 = vpop.permute.xlu1 %113 }
 0x209   :  { %v116_v4 = vadd.f32 %v114_v3, %v108_v28  ;;  %v117_v5 = vadd.f32 %v114_v3, %v109_v63  ;;  %398 = vadd.xlane.f32.xlu1 %v397_v0 }
 0x20b   :  { %v118_v6 = vmax.f32 %v116_v4, 0.0  ;;  %v119_v8 = vmax.f32 %v117_v5, 0.0 }
 0x20d   :  { %120 = vst [vmem:[#allocation2] sm:$0xf] %v118_v6  ;;  %121 = vst [vmem:[#allocation2 + $0x8] sm:$0xf] %v119_v8 }
 0x21a   :  { %413 = vperm.xlu1 %466, %v410_v9  }
 0x231   :  { %v188_v10 = vpop.xlane.xlu0 %187 }
 0x232   :  { %v196_v11 = vmul.f32 0.00390625, %v188_v10 }
 0x234   :  { %v198_v15 = vmul.f32 %v196_v11, %v196_v11  ;;  %v202_v30 = vsub.f32 %v623_v1, %v196_v11  ;;  %v203_v31 = vsub.f32 %v625_v2, %v196_v11 }
 0x239   :  { %v210_v21 = vpop.permute.xlu0 %209 }
 0x23a   :  { %v195_v12 = vpop.xlane.xlu1 %194 }
 0x23b   :  { %v197_v16 = vmul.f32 0.00390625, %v195_v12 }
 0x23d   :  { %v199_v17 = vsub.f32 %v197_v16, %v198_v15  ;;  %v218_v29 = vpop.permute.xlu0 %217 }
 0x23e   :  { %v287_v18 = vpop.xlane.xlu1 %286 }
 0x23f   :  { %v200_v19 = vadd.f32 1e-05, %v199_v17  ;;  %v295_v20 = vmul.f32 0.00390625, %v287_v18 }
 0x241   :  { %469 = vrsqrt.f32 %v200_v19  ;;  %v297_v23 = vmul.f32 %v295_v20, %v295_v20  ;;  %v309_v33 = vpop.permute.xlu0 %308  ;;  %v301_v43 = vsub.f32 %v671_v45, %v295_v20  ;;  %v302_v44 = vsub.f32 %v673_v46, %v295_v20 }
 0x242   :  { %v294_v22 = vpop.xlane.xlu1 %293 }
 0x243   :  { %v296_v24 = vmul.f32 0.00390625, %v294_v22 }
 0x245   :  { %v298_v25 = vsub.f32 %v296_v24, %v297_v23  ;;  %v422_v40 = vpop.permute.xlu0 %421 }
 0x247   :  { %v299_v26 = vadd.f32 1e-05, %v298_v25 }
 0x249   :  { %471 = vrsqrt.f32 %v299_v26  ;;  %v317_v51 = vpop.permute.xlu0 %316 }
 0x24e   :  { %v470_v32 = vpop.eup %469 }
 0x24f   :  { %v204_v34 = vmul.f32 %v470_v32, %v202_v30  ;;  %v205_v35 = vmul.f32 %v470_v32, %v203_v31 }
 0x251   :  { %v212_v36 = vmul.f32 %v210_v21, %v204_v34  ;;  %v213_v37 = vmul.f32 %v210_v21, %v205_v35 }
 0x253   :  { %v220_v38 = vadd.f32 %v218_v29, %v212_v36  ;;  %v221_v39 = vadd.f32 %v218_v29, %v213_v37 }
 0x255   :  { %v222_v41 = vmax.f32 %v220_v38, 0.0  ;;  %v223_v42 = vmax.f32 %v221_v39, 0.0 }
 0x256   :  { %v472_v47 = vpop.eup %471 }
 0x257   :  { %v226_v48 = vrot.slane %v222_v41, 4  ;;  %v227_v1 = vrot.slane %v223_v42, 4  ;;  %v303_v14 = vmul.f32 %v472_v47, %v301_v43  ;;  %v304_v2 = vmul.f32 %v472_v47, %v302_v44 }
 0x259   :  { %230 = vst [vmem:[#allocation2] sm:$0xf0] %v226_v48  ;;  %231 = vst [vmem:[#allocation2 + $0x8] sm:$0xf0] %v227_v1  ;;  %v311_v49 = vmul.f32 %v309_v33, %v303_v14  ;;  %v312_v50 = vmul.f32 %v309_v33, %v304_v2 }
 0x25b   :  { %v319_v52 = vadd.f32 %v317_v51, %v311_v49  ;;  %v320_v54 = vadd.f32 %v317_v51, %v312_v50 }
 0x25d   :  { %v321_v56 = vmax.f32 %v319_v52, 0.0  ;;  %v322_v7 = vmax.f32 %v320_v54, 0.0 }
 0x25f   :  { %323 = vst [vmem:[#allocation2 + $0x10] sm:$0xf] %v321_v56  ;;  %324 = vst [vmem:[#allocation2 + $0x18] sm:$0xf] %v322_v7 }
 0x28e   :  { %v392_v13 = vpop.xlane.xlu1 %391 }
 0x28f   :  { %v400_v45 = vmul.f32 0.00390625, %v392_v13 }
 0x291   :  { %v402_v46 = vmul.f32 %v400_v45, %v400_v45  ;;  %v406_v61 = vsub.f32 %v741_v55, %v400_v45  ;;  %v407_v62 = vsub.f32 %v743_v53, %v400_v45 }
 0x292   :  { %v399_v57 = vpop.xlane.xlu1 %398 }
 0x293   :  { %v401_v58 = vmul.f32 0.00390625, %v399_v57 }
 0x295   :  { %v403_v59 = vsub.f32 %v401_v58, %v402_v46 }
 0x296   :  { %v414_v0 = vpop.permute.xlu1 %413 }
 0x297   :  { %v404_v60 = vadd.f32 1e-05, %v403_v59 }
 0x299   :  { %473 = vrsqrt.f32 %v404_v60 }
 0x2a6   :  { %v474_v27 = vpop.eup %473 }
 0x2a7   :  { %v408_v28 = vmul.f32 %v474_v27, %v406_v61  ;;  %v409_v63 = vmul.f32 %v474_v27, %v407_v62 }
 0x2a9   :  { %v416_v3 = vmul.f32 %v414_v0, %v408_v28  ;;  %v417_v4 = vmul.f32 %v414_v0, %v409_v63 }
 0x2ab   :  { %v424_v5 = vadd.f32 %v422_v40, %v416_v3  ;;  %v425_v6 = vadd.f32 %v422_v40, %v417_v4 }
 0x2ad   :  { %v426_v8 = vmax.f32 %v424_v5, 0.0  ;;  %v427_v9 = vmax.f32 %v425_v6, 0.0 }
 0x2af   :  { %v430_v10 = vrot.slane %v426_v8, 4  ;;  %v431_v11 = vrot.slane %v427_v9, 4 }
 0x2b1   :  { %434 = vst [vmem:[#allocation2 + $0x10] sm:$0xf0] %v430_v10  ;;  %435 = vst [vmem:[#allocation2 + $0x18] sm:$0xf0] %v431_v11 }
 0x2b2   :  { %486 = shalt.err (!%p483_p4)
}
 0x2b3   :  { %s501_s15 = smov 256  }
 0x2b4   :  { %447 = dma.vmem_to_hbm [thread:$0]  %s442_s13, 512, %s774_s4, [#allocation3], %s501_s15, %s501_s15, %s498_s18  }
 0x2b5   :  { %495 = dma.done.wait [#allocation3], 512  }
 0x2b6   :  { %496 = vsyncadd [#allocation3], 4294966784 }
 0x2b7   :  { %451 = vsyncpa [#allocation3], 1 }

</bundles_post_ra>
